<compile_context>
chip_gen: v7x
topology: tpu7x:2x2x1
jax: 0.10.0
libtpu: 0.0.40
codegen_flags: <defaults>
</compile_context>

<pallas_src>
import functools

import jax
import jax.numpy as jnp
from jax.experimental import pallas as pl
from jax.experimental.pallas import tpu as pltpu

LANE = 128           # lane tile (fast axis)
ROW_ALIGN = 32       # int8 native sublane tile -> pad rows to multiples of 32
MAX_BLK_ROWS = 1024  # ~0.5 MiB f32/buffer; double-buffered fits every gen's VMEM


def _dropadj_kernel(seed_ref, val_ref, out_ref, mask_ref, *,
                    thresh31, ratio, blk_elems):
    rows, lanes = val_ref.shape
    # Counter-based PRNG: global element index -> murmur3 fmix32.
    base = pl.program_id(0) * blk_elems
    idx = (base
           + jax.lax.broadcasted_iota(jnp.int32, (rows, lanes), 0) * lanes
           + jax.lax.broadcasted_iota(jnp.int32, (rows, lanes), 1))
    h = idx.astype(jnp.uint32) + seed_ref[0].astype(jnp.uint32) * jnp.uint32(0x9E3779B9)
    h = h ^ (h >> jnp.uint32(16))
    h = h * jnp.uint32(0x85EBCA6B)
    h = h ^ (h >> jnp.uint32(13))
    h = h * jnp.uint32(0xC2B2AE35)
    h = h ^ (h >> jnp.uint32(16))
    # 31-bit uniform vs 31-bit integer threshold: keep iff u > dp.
    keep = (h >> jnp.uint32(1)).astype(jnp.int32) > jnp.int32(thresh31)
    out_ref[...] = jnp.where(keep,
                             val_ref[...] * jnp.float32(ratio),
                             jnp.float32(0.0))
    mask_ref[...] = keep.astype(jnp.int8)


def drop_adj(row, col, val, *, dp=0.3, doscale=True, training=True, seed=0):
    """Pallas implementation of DropAdj.forward on a COO adjacency.

    Returns (row, col, new_val, keep_mask).  Dropped edges have value 0 and
    keep_mask False.
    """
    if dp < 1e-6 or not training:
        return row, col, val, jnp.ones(val.shape, dtype=bool)

    nnz = val.shape[0]
    rows_needed = -(-nnz // LANE)
    # Small inputs: one block covering all (32-aligned) rows.  Large inputs:
    # 1024-row blocks, rows padded to a multiple of the block.
    blk_rows = min(MAX_BLK_ROWS,
                   ((rows_needed + ROW_ALIGN - 1) // ROW_ALIGN) * ROW_ALIGN)
    r_rows = ((rows_needed + blk_rows - 1) // blk_rows) * blk_rows
    pad = r_rows * LANE - nnz
    # TODO(synk): keeping the caller's edge values in a pre-padded lane-dense
    # (R,128) slab would remove this extra pad/reshape HBM pass entirely.
    vp = jnp.pad(val.astype(jnp.float32), (0, pad)).reshape(r_rows, LANE)

    ratio = (1.0 / (1.0 - dp)) if doscale else 1.0
    thresh31 = min(int(dp * (1 << 31)), (1 << 31) - 1)
    seed_arr = jnp.asarray([seed], dtype=jnp.int32)

    kernel = functools.partial(_dropadj_kernel, thresh31=thresh31,
                               ratio=float(ratio), blk_elems=blk_rows * LANE)

    out_v, mask = pl.pallas_call(
        kernel,
        out_shape=(
            jax.ShapeDtypeStruct((r_rows, LANE), jnp.float32),
            jax.ShapeDtypeStruct((r_rows, LANE), jnp.int8),
        ),
        grid=(r_rows // blk_rows,),
        in_specs=[
            pl.BlockSpec(memory_space=pltpu.SMEM),             # seed scalar
            pl.BlockSpec((blk_rows, LANE), lambda i: (i, 0)),  # values tile
        ],
        out_specs=(
            pl.BlockSpec((blk_rows, LANE), lambda i: (i, 0)),
            pl.BlockSpec((blk_rows, LANE), lambda i: (i, 0)),
        ),
        compiler_params=pltpu.CompilerParams(
            dimension_semantics=("parallel",)),  # sharded across TCs on v7x
    )(seed_arr, vp)

    new_val = out_v.reshape(-1)[:nnz]
    keep = mask.reshape(-1)[:nnz].astype(bool)
    # TODO(synk): torch_sparse.masked_select_nnz compacts to a data-dependent
    # nnz (dynamic shape); no static-shape Pallas equivalent, so we return the
    # full-length value vector with dropped entries zeroed plus the keep-mask.
    return row, col, new_val, keep


if __name__ == "__main__":
    key = jax.random.PRNGKey(0)
    k_row, k_col, k_val = jax.random.split(key, 3)

    num_nodes = 16
    nnz = 200
    row = jax.random.randint(k_row, (nnz,), 0, num_nodes, dtype=jnp.int32)
    col = jax.random.randint(k_col, (nnz,), 0, num_nodes, dtype=jnp.int32)
    val = jax.random.uniform(k_val, (nnz,), dtype=jnp.float32) + 0.5

    dp = 0.3
    r_out, c_out, v_out, keep = drop_adj(
        row, col, val, dp=dp, doscale=True, training=True, seed=0)
    jax.block_until_ready((r_out, c_out, v_out, keep))

    # kept edges scaled by exactly 1/(1-dp), dropped edges are zero
    ratio = 1.0 / (1.0 - dp)
    kept_ok = bool(jnp.allclose(jnp.where(keep, v_out, 0.0),
                                jnp.where(keep, val * ratio, 0.0),
                                rtol=1e-6))
    drop_ok = bool(jnp.all(jnp.where(keep, 0.0, v_out) == 0.0))
    assert kept_ok and drop_ok

    # loose statistical sanity: keep rate should be near 1 - dp = 0.7
    keep_rate = float(jnp.mean(keep.astype(jnp.float32)))
    assert 0.3 < keep_rate < 0.98

    # no-scale path leaves kept values untouched
    _, _, v_ns, keep_ns = drop_adj(
        row, col, val, dp=dp, doscale=False, training=True, seed=7)
    assert bool(jnp.allclose(jnp.where(keep_ns, v_ns, 0.0),
                             jnp.where(keep_ns, val, 0.0), rtol=1e-6))

    # identity path (eval mode) returns values untouched
    _, _, v_eval, keep_eval = drop_adj(row, col, val, dp=dp, training=False)
    assert bool(jnp.all(v_eval == val)) and bool(jnp.all(keep_eval))

    print("KERNEL_OK")
</pallas_src>

<mosaic_0001>
module attributes {stable_mosaic.version = 11 : i64} {
  func.func @_dropadj_kernel(%arg0: i32, %arg1: memref<1xi32, #tpu.memory_space<smem>>, %arg2: memref<32x128xf32, #tpu.memory_space<vmem>>, %arg3: memref<32x128xf32, #tpu.memory_space<vmem>>, %arg4: memref<32x128xi8, #tpu.memory_space<vmem>>) attributes {dimension_semantics = [#tpu.dimension_semantics<parallel>], iteration_bounds = array<i64: 1>, scalar_prefetch = 0 : i64, scratch_operands = 0 : i64, tpu.core_type = #tpu.core_type<tc>, window_params = [{transform_indices = @transform_0, window_bounds = array<i64: 1>}, {transform_indices = @transform_1, window_bounds = array<i64: 32, 128>}, {transform_indices = @transform_2, window_bounds = array<i64: 32, 128>}, {transform_indices = @transform_3, window_bounds = array<i64: 32, 128>}]} {
    %c4096_i32 = arith.constant 4096 : i32
    %0 = arith.muli %arg0, %c4096_i32 : i32
    %1 = tpu.iota {dimensions = array<i32: 0>} : vector<32x128xi32>
    %c128_i32 = arith.constant 128 : i32
    %2 = vector.broadcast %c128_i32 : i32 to vector<32x128xi32>
    %3 = arith.muli %1, %2 : vector<32x128xi32>
    %4 = vector.broadcast %0 : i32 to vector<32x128xi32>
    %5 = arith.addi %4, %3 : vector<32x128xi32>
    %6 = tpu.iota {dimensions = array<i32: 1>} : vector<32x128xi32>
    %7 = arith.addi %5, %6 : vector<32x128xi32>
    %c0 = arith.constant 0 : index
    %8 = memref.load %arg1[%c0] : memref<1xi32, #tpu.memory_space<smem>>
    %c-1640531527_i32 = arith.constant -1640531527 : i32
    %9 = arith.muli %8, %c-1640531527_i32 : i32
    %10 = vector.broadcast %9 : i32 to vector<32x128xi32>
    %11 = arith.addi %7, %10 : vector<32x128xi32>
    %c16_i32 = arith.constant 16 : i32
    %12 = vector.broadcast %c16_i32 : i32 to vector<32x128xi32>
    %13 = arith.shrui %11, %12 : vector<32x128xi32>
    %14 = arith.xori %11, %13 : vector<32x128xi32>
    %c-2048144789_i32 = arith.constant -2048144789 : i32
    %15 = vector.broadcast %c-2048144789_i32 : i32 to vector<32x128xi32>
    %16 = arith.muli %14, %15 : vector<32x128xi32>
    %c13_i32 = arith.constant 13 : i32
    %17 = vector.broadcast %c13_i32 : i32 to vector<32x128xi32>
    %18 = arith.shrui %16, %17 : vector<32x128xi32>
    %19 = arith.xori %16, %18 : vector<32x128xi32>
    %c-1028477387_i32 = arith.constant -1028477387 : i32
    %20 = vector.broadcast %c-1028477387_i32 : i32 to vector<32x128xi32>
    %21 = arith.muli %19, %20 : vector<32x128xi32>
    %c16_i32_0 = arith.constant 16 : i32
    %22 = vector.broadcast %c16_i32_0 : i32 to vector<32x128xi32>
    %23 = arith.shrui %21, %22 : vector<32x128xi32>
    %24 = arith.xori %21, %23 : vector<32x128xi32>
    %c1_i32 = arith.constant 1 : i32
    %25 = vector.broadcast %c1_i32 : i32 to vector<32x128xi32>
    %26 = arith.shrui %24, %25 : vector<32x128xi32>
    %c644245094_i32 = arith.constant 644245094 : i32
    %27 = vector.broadcast %c644245094_i32 : i32 to vector<32x128xi32>
    %28 = arith.cmpi sgt, %26, %27 : vector<32x128xi32>
    %c0_1 = arith.constant 0 : index
    %c0_2 = arith.constant 0 : index
    %29 = vector.load %arg2[%c0_1, %c0_2] : memref<32x128xf32, #tpu.memory_space<vmem>>, vector<32x128xf32>
    %cst = arith.constant 1.42857146 : f32
    %30 = vector.broadcast %cst : f32 to vector<32x128xf32>
    %31 = arith.mulf %29, %30 : vector<32x128xf32>
    %cst_3 = arith.constant 0.000000e+00 : f32
    %32 = vector.broadcast %cst_3 : f32 to vector<32x128xf32>
    %33 = arith.select %28, %31, %32 : vector<32x128xi1>, vector<32x128xf32>
    %c0_4 = arith.constant 0 : index
    %c0_5 = arith.constant 0 : index
    %34 = vector.load %arg3[%c0_4, %c0_5] : memref<32x128xf32, #tpu.memory_space<vmem>>, vector<32x128xf32>
    tpu.vector_store %arg3[%c0_4, %c0_5], %33 {strides = array<i32>} : memref<32x128xf32, #tpu.memory_space<vmem>>, vector<32x128xf32>,
    %35 = arith.extui %28 : vector<32x128xi1> to vector<32x128xi8>
    %c0_6 = arith.constant 0 : index
    %c0_7 = arith.constant 0 : index
    %36 = vector.load %arg4[%c0_6, %c0_7] : memref<32x128xi8, #tpu.memory_space<vmem>>, vector<32x128xi8>
    tpu.vector_store %arg4[%c0_6, %c0_7], %35 {strides = array<i32>} : memref<32x128xi8, #tpu.memory_space<vmem>>, vector<32x128xi8>,
    return
  }
  func.func @transform_0(%arg0: i32) -> i32 {
    %c0_i32 = arith.constant 0 : i32
    %c0_i32_0 = arith.constant 0 : i32
    return %c0_i32 : i32
  }
  func.func @transform_1(%arg0: i32) -> (i32, i32) {
    %c0_i32 = arith.constant 0 : i32
    %c0_i32_0 = arith.constant 0 : i32
    return %arg0, %c0_i32 : i32, i32
  }
  func.func @transform_2(%arg0: i32) -> (i32, i32) {
    %c0_i32 = arith.constant 0 : i32
    %c0_i32_0 = arith.constant 0 : i32
    return %arg0, %c0_i32 : i32, i32
  }
  func.func @transform_3(%arg0: i32) -> (i32, i32) {
    %c0_i32 = arith.constant 0 : i32
    %c0_i32_0 = arith.constant 0 : i32
    return %arg0, %c0_i32 : i32, i32
  }
}

</mosaic_0001>

<bundles_post_ra>
// kernel: tpu_custom_call.1
= control target key start
LH: loop header
LB: loop body
LE: loop exit
PB: predicated region body
PF: predicated region fallthrough
CT: control target
= control target key end

     0   :  { %10 = vsyncpa [#allocation4], 0  ;;  %s324_s0 = inlined_call_operand.<no memory space> [shape: s32[1], index: 0, kind: input, shape index: {}]   ;;  %s325_s1 = inlined_call_operand.hbm [shape: f32[32,128], index: 1, kind: input, shape index: {}]   ;;  %s326_s2 = inlined_call_operand.hbm [shape: f32[32,128], index: 2, kind: output, shape index: {0}]   ;;  %s327_s3 = inlined_call_operand.hbm [shape: s8[32,128], index: 3, kind: output, shape index: {1}]  }
   0x1   :  { %11 = vsyncpa [#allocation5], 0 }
   0x2   :  { %12 = vsyncpa [#allocation8], 0  ;;  %s230_s12 = smov [#allocation3]   ;;  %s158_s16 = scalar_lea.hbm %s325_s1, 512 }
   0x3   :  { %s20_s13 = sshll.u32 %s230_s12, 4  ;;  %p159_p0 = scmp.ne.s32.totalorder %s325_s1, %s158_s16  ;;  %s21_s13 = int_to_ptr.vmem [resolvable:$true] %s20_s13 }
   0x4   :  { %p162_p1 = scmp.lt.u32.totalorder %s158_s16, %s325_s1 }
   0x6   :  { %p164_p2 = pnand %p162_p1, %p159_p0 }
   0x8   :  { %167 = shalt.err (!%p164_p2)
}
   0x9   :  { %s168_s21 = scalar_lea.vmem %s21_s13, 512  ;;  %p173_p4 = scmp.lt.s32.totalorder %s21_s13, %s21_s13 }
   0xa   :  { %p169_p3 = scmp.ne.s32.totalorder %s21_s13, %s168_s21  ;;  %p174_p5 = scmp.lt.s32.totalorder %s168_s21, %s168_s21 }
   0xc   :  { %p175_p6 = por %p174_p5, %p173_p4 }
   0xe   :  { %p176_p7 = pnand %p175_p6, %p169_p3 }
  0x10   :  { %179 = shalt.err (!%p176_p7)
}
  0x11   :  { %s231_s22 = smov 128   ;;  %s232_s23 = smov 8  }
  0x12   :  { %26 = dma.hbm_to_vmem [thread:$0]  %s325_s1, 512, %s21_s13, [#allocation4], %s231_s22, %s231_s22, %s232_s23  }
  0x13   :  { %224 = dma.done.wait [#allocation4], 512  }
  0x14   :  { %225 = vsyncadd [#allocation4], 4294966784  ;;  %v33_v0 = vlaneseq  ;;  %s54_s28 = smul.u32 2654435769, %s324_s0  ;;  %v100_v41 = vld [vmem:[#allocation3] sm:$0xff]  ;;  %v101_v47 = vld [vmem:[#allocation3 + $0x8] sm:$0xff] }
  0x15   :  { %v102_v48 = vld [vmem:[#allocation3 + $0x10] sm:$0xff]  ;;  %v104_v49 = vmul.f32 1.4285715, %v100_v41  ;;  %v103_v52 = vld [vmem:[#allocation3 + $0x18] sm:$0xff]  ;;  %v105_v55 = vmul.f32 1.4285715, %v101_v47 }
  0x16   :  { %v34_v1 = vshrl.u32 %v33_v0, 7  ;;  %v48_v2 = vand.u32 127, %v33_v0  ;;  %v55_v7 = vstv %s54_s28  ;;  %v106_v57 = vmul.f32 1.4285715, %v102_v48  ;;  %s233_s0 = smov [#allocation6]   ;;  %s234_s29 = smov [#allocation7]  }
  0x17   :  { %v107_v61 = vmul.f32 1.4285715, %v103_v52  ;;  %s126_s1 = sshll.u32 %s233_s0, 4  ;;  %s139_s30 = sshll.u32 %s234_s29, 4  ;;  %s127_s1 = int_to_ptr.vmem [resolvable:$true] %s126_s1  ;;  %s290_s30 = int_to_ptr.vmem [resolvable:$true] %s139_s30 }
  0x18   :  { %v38_v3 = vmul.u32 128, %v34_v1  ;;  %v35_v4 = vadd.s32 8, %v34_v1  ;;  %v36_v5 = vadd.s32 16, %v34_v1  ;;  %v37_v6 = vadd.s32 24, %v34_v1  ;;  %s180_s4 = scalar_lea.vmem %s127_s1, 512  ;;  %p185_p9 = scmp.lt.s32.totalorder %s127_s1, %s127_s1 }
  0x19   :  { %p181_p8 = scmp.ne.s32.totalorder %s127_s1, %s180_s4  ;;  %p186_p10 = scmp.lt.s32.totalorder %s180_s4, %s180_s4 }
  0x1a   :  { %v49_v8 = vadd.s32 %v48_v2, %v38_v3  ;;  %v39_v9 = vmul.u32 128, %v35_v4  ;;  %v40_v10 = vmul.u32 128, %v36_v5  ;;  %v235_v5 = vmov 0  }
  0x1b   :  { %v41_v11 = vmul.u32 128, %v37_v6  ;;  %p187_p11 = por %p186_p10, %p185_p9 }
  0x1c   :  { %v56_v12 = vadd.s32 %v55_v7, %v49_v8  ;;  %v50_v13 = vadd.s32 %v48_v2, %v39_v9  ;;  %v51_v14 = vadd.s32 %v48_v2, %v40_v10 }
  0x1d   :  { %v52_v15 = vadd.s32 %v48_v2, %v41_v11  ;;  %p188_p12 = pnand %p187_p11, %p181_p8 }
  0x1e   :  { %v60_v16 = vshrl.u32 %v56_v12, 16  ;;  %v57_v17 = vadd.s32 %v55_v7, %v50_v13  ;;  %v58_v18 = vadd.s32 %v55_v7, %v51_v14 }
  0x1f   :  { %v59_v19 = vadd.s32 %v55_v7, %v52_v15 }
  0x20   :  { %v64_v20 = vxor.u32 %v60_v16, %v56_v12  ;;  %v61_v21 = vshrl.u32 %v57_v17, 16  ;;  %v62_v22 = vshrl.u32 %v58_v18, 16 }
  0x21   :  { %v63_v23 = vshrl.u32 %v59_v19, 16 }
  0x22   :  { %v68_v24 = vmul.u32 2246822507, %v64_v20  ;;  %v65_v25 = vxor.u32 %v61_v21, %v57_v17  ;;  %v66_v26 = vxor.u32 %v62_v22, %v58_v18 }
  0x23   :  { %v67_v27 = vxor.u32 %v63_v23, %v59_v19 }
  0x24   :  { %v72_v28 = vshrl.u32 %v68_v24, 13  ;;  %v69_v29 = vmul.u32 2246822507, %v65_v25  ;;  %v70_v30 = vmul.u32 2246822507, %v66_v26 }
  0x25   :  { %v71_v31 = vmul.u32 2246822507, %v67_v27 }
  0x26   :  { %v76_v32 = vxor.u32 %v72_v28, %v68_v24  ;;  %v73_v33 = vshrl.u32 %v69_v29, 13  ;;  %v74_v34 = vshrl.u32 %v70_v30, 13 }
  0x27   :  { %v75_v35 = vshrl.u32 %v71_v31, 13 }
  0x28   :  { %v80_v36 = vmul.u32 3266489909, %v76_v32  ;;  %v77_v37 = vxor.u32 %v73_v33, %v69_v29  ;;  %v78_v38 = vxor.u32 %v74_v34, %v70_v30 }
  0x29   :  { %v79_v39 = vxor.u32 %v75_v35, %v71_v31 }
  0x2a   :  { %v84_v40 = vshrl.u32 %v80_v36, 16  ;;  %v81_v42 = vmul.u32 3266489909, %v77_v37  ;;  %v82_v43 = vmul.u32 3266489909, %v78_v38 }
  0x2b   :  { %v83_v44 = vmul.u32 3266489909, %v79_v39 }
  0x2c   :  { %v88_v45 = vxor.u32 %v84_v40, %v80_v36  ;;  %v85_v46 = vshrl.u32 %v81_v42, 16  ;;  %v86_v50 = vshrl.u32 %v82_v43, 16 }
  0x2d   :  { %v87_v51 = vshrl.u32 %v83_v44, 16 }
  0x2e   :  { %v92_v53 = vshrl.u32 %v88_v45, 1  ;;  %v89_v54 = vxor.u32 %v85_v46, %v81_v42  ;;  %v90_v56 = vxor.u32 %v86_v50, %v82_v43 }
  0x2f   :  { %v91_v58 = vxor.u32 %v87_v51, %v83_v44 }
  0x30   :  { %vm274_vm0 = vcmp.gt.s32.totalorder %v92_v53, 644245094  ;;  %v93_v60 = vshrl.u32 %v89_v54, 1  ;;  %v94_v63 = vshrl.u32 %v90_v56, 1 }
  0x31   :  { %v108_v62 = vsel %vm274_vm0, %v104_v49, 0.0  ;;  %v95_v0 = vshrl.u32 %v91_v58, 1 }
  0x32   :  { %112 = vst [vmem:[#allocation6] sm:$0xff] %v108_v62  ;;  %vm280_vm1 = vcmp.gt.s32.totalorder %v93_v60, 644245094  ;;  %vm98_vm2 = vcmp.gt.s32.totalorder %v94_v63, 644245094 }
  0x33   :  { %v109_v2 = vsel %vm280_vm1, %v105_v55, 0.0  ;;  %vm99_vm3 = vcmp.gt.s32.totalorder %v95_v0, 644245094  ;;  %vm116_vm4 = vmpackc.low %vm280_vm1, %vm274_vm0  ;;  %v110_v3 = vsel %vm98_vm2, %v106_v57, 0.0 }
  0x34   :  { %113 = vst [vmem:[#allocation6 + $0x8] sm:$0xff] %v109_v2  ;;  %v111_v4 = vsel %vm99_vm3, %v107_v61, 0.0  ;;  %vm117_vm5 = vmpackc.low %vm99_vm3, %vm98_vm2 }
  0x35   :  { %114 = vst [vmem:[#allocation6 + $0x10] sm:$0xff] %v110_v3  ;;  %115 = vst [vmem:[#allocation6 + $0x18] sm:$0xff] %v111_v4 }
  0x36   :  { %vm118_vm6 = vmpackc.even %vm117_vm5, %vm116_vm4 }
  0x37   :  { %v119_v6 = vsel %vm118_vm6, 16843009, %v235_v5 }
  0x38   :  { %191 = shalt.err (!%p188_p12)
}
  0x39   :  { %s192_s7 = scalar_lea.hbm %s326_s2, 512 }
  0x3a   :  { %p193_p13 = scmp.ne.s32.totalorder %s326_s2, %s192_s7  ;;  %p196_p0 = scmp.lt.u32.totalorder %s192_s7, %s326_s2 }
  0x3c   :  { %p198_p1 = pnand %p196_p0, %p193_p13 }
  0x3e   :  { %201 = shalt.err (!%p198_p1)
}
  0x3f   :  { %132 = dma.vmem_to_hbm [thread:$0]  %s127_s1, 512, %s326_s2, [#allocation5], %s231_s22, %s231_s22, %s232_s23   ;;  %120 = vst [vmem:[#allocation7] sm:$0xff] %v119_v6 }
  0x40   :  { %s202_s14 = scalar_lea.vmem %s290_s30, 128  ;;  %p207_p3 = scmp.lt.s32.totalorder %s290_s30, %s290_s30 }
  0x41   :  { %p203_p2 = scmp.ne.s32.totalorder %s290_s30, %s202_s14  ;;  %p208_p4 = scmp.lt.s32.totalorder %s202_s14, %s202_s14 }
  0x43   :  { %p209_p5 = por %p208_p4, %p207_p3 }
  0x45   :  { %p210_p6 = pnand %p209_p5, %p203_p2 }
  0x47   :  { %213 = shalt.err (!%p210_p6)
}
  0x48   :  { %s214_s17 = scalar_lea.hbm %s327_s3, 128 }
  0x49   :  { %p215_p7 = scmp.ne.s32.totalorder %s327_s3, %s214_s17  ;;  %p218_p8 = scmp.lt.u32.totalorder %s214_s17, %s327_s3 }
  0x4b   :  { %p220_p9 = pnand %p218_p8, %p215_p7 }
  0x4d   :  { %223 = shalt.err (!%p220_p9)
}
  0x4e   :  { %142 = dma.vmem_to_hbm [thread:$0]  %s290_s30, 128, %s327_s3, [#allocation8]  }
  0x4f   :  { %226 = dma.done.wait [#allocation5], 512  }
  0x50   :  { %227 = vsyncadd [#allocation5], 4294966784 }
  0x51   :  { %228 = dma.done.wait [#allocation8], 128  }
  0x52   :  { %229 = vsyncadd [#allocation8], 4294967168 }
  0x53   :  { %149 = vsyncpa [#allocation4], 1 }
  0x54   :  { %150 = vsyncpa [#allocation5], 1 }
  0x55   :  { %151 = vsyncpa [#allocation8], 1 }

</bundles_post_ra>
